<compile_context>
chip_gen: v6e
topology: v6e:2x2x1
jax: 0.10.0
libtpu: 0.0.40
codegen_flags: <defaults>
</compile_context>

<pallas_src>
import math
from functools import partial

import jax
import jax.numpy as jnp
from jax import lax
from jax.experimental import pallas as pl
from jax.experimental.pallas import tpu as pltpu


def _linear_kernel(*refs, scale, has_bias):
    if has_bias:
        x_ref, w_ref, b_ref, o_ref, acc_ref = refs
    else:
        x_ref, w_ref, o_ref, acc_ref = refs
        b_ref = None

    k = pl.program_id(2)

    @pl.when(k == 0)
    def _():
        acc_ref[...] = jnp.zeros_like(acc_ref)

    # x_ref: (TM, TK), w_ref: (TN, TK) -> contract K on the MXU, f32 accumulate.
    acc_ref[...] += lax.dot_general(
        x_ref[...],
        w_ref[...],
        dimension_numbers=(((1,), (1,)), ((), ())),
        preferred_element_type=jnp.float32,
    )

    @pl.when(k == pl.num_programs(2) - 1)
    def _():
        out = acc_ref[...] * scale          # scale once per output tile
        if b_ref is not None:
            out = out + b_ref[...]          # bias is NOT scaled (torch semantics)
        o_ref[...] = out.astype(o_ref.dtype)


def _pick_m_or_n_tile(dim, t_max):
    # Full-extent blocks are always legal; otherwise t_max is (8,128)-aligned
    # and ragged tail blocks are masked by Pallas on store.
    return dim if dim <= t_max else t_max


def _pick_k_tile(k, tk_max):
    # The K axis is accumulated, so the tile must divide K exactly.
    if k <= tk_max:
        return k
    t = (tk_max // 128) * 128
    while t >= 128:
        if k % t == 0:
            return t
        t -= 128
    # TODO(synk): mask the ragged K tail instead of keeping full K resident.
    return k


def linear_layer(x, weight, bias=None, *, tm=512, tn=256, tk=512):
    """Pallas equivalent of LinearLayer.forward.

    x:      (..., in_features)
    weight: (out_features, in_features)   -- torch convention, used as-is
    bias:   (out_features,) or None
    """
    out_features, in_features = weight.shape
    scale = 1.0 / math.sqrt(in_features)

    leading = x.shape[:-1]
    m = math.prod(leading) if leading else 1
    x2 = x.reshape(m, in_features)

    tm = _pick_m_or_n_tile(m, tm)
    tn = _pick_m_or_n_tile(out_features, tn)
    tk = _pick_k_tile(in_features, tk)

    grid = (pl.cdiv(m, tm), pl.cdiv(out_features, tn), pl.cdiv(in_features, tk))

    x_spec = pl.BlockSpec((tm, tk), lambda i, j, k: (i, k))
    w_spec = pl.BlockSpec((tn, tk), lambda i, j, k: (j, k))
    o_spec = pl.BlockSpec((tm, tn), lambda i, j, k: (i, j))
    out_shape = jax.ShapeDtypeStruct((m, out_features), x.dtype)
    scratch = [pltpu.VMEM((tm, tn), jnp.float32)]
    cparams = pltpu.CompilerParams(
        dimension_semantics=("parallel", "parallel", "arbitrary")
    )

    has_bias = bias is not None
    if has_bias:
        b2 = bias.reshape(1, out_features)
        b_spec = pl.BlockSpec((1, tn), lambda i, j, k: (0, j))
        in_specs = [x_spec, w_spec, b_spec]
        args = (x2, weight, b2)
    else:
        in_specs = [x_spec, w_spec]
        args = (x2, weight)

    y2 = pl.pallas_call(
        partial(_linear_kernel, scale=scale, has_bias=has_bias),
        out_shape=out_shape,
        grid_spec=pltpu.PrefetchScalarGridSpec(
            num_scalar_prefetch=0,
            grid=grid,
            in_specs=in_specs,
            out_specs=o_spec,
            scratch_shapes=scratch,
        ),
        compiler_params=cparams,
    )(*args)

    return y2.reshape(*leading, out_features)


if __name__ == "__main__":
    key = jax.random.PRNGKey(0)
    kx, kw = jax.random.split(key)

    in_features, out_features = 32, 32
    # x with leading dims (batch=2, seq=8), feature dim = in_features
    x = jax.random.normal(kx, (2, 8, in_features), dtype=jnp.float32)
    # weight ~ torch.randn(out_features, in_features)
    weight = jax.random.normal(kw, (out_features, in_features), dtype=jnp.float32)
    # bias=True case initializes zeros; default module has bias=False.
    bias = jnp.zeros((out_features,), dtype=jnp.float32)

    # bias=False path (module default)
    y_nobias = linear_layer(x, weight, None)
    # bias=True path
    y_bias = linear_layer(x, weight, bias)

    jax.block_until_ready(y_nobias)
    jax.block_until_ready(y_bias)

    # reference check in plain JAX
    ref = jnp.einsum("bsk,nk->bsn", x, weight / math.sqrt(in_features))
    assert y_nobias.shape == (2, 8, out_features)
    assert jnp.allclose(y_nobias, ref, atol=1e-5, rtol=1e-5)
    assert jnp.allclose(y_bias, ref, atol=1e-5, rtol=1e-5)

    print("KERNEL_OK")
</pallas_src>

<mosaic_0001>
module attributes {stable_mosaic.version = 11 : i64} {
  func.func @_linear_kernel(%arg0: i32, %arg1: i32, %arg2: i32, %arg3: memref<16x32xf32, #tpu.memory_space<vmem>>, %arg4: memref<32x32xf32, #tpu.memory_space<vmem>>, %arg5: memref<16x32xf32, #tpu.memory_space<vmem>>, %arg6: memref<16x32xf32, #tpu.memory_space<vmem>>) attributes {dimension_semantics = [#tpu.dimension_semantics<parallel>, #tpu.dimension_semantics<parallel>, #tpu.dimension_semantics<arbitrary>], iteration_bounds = array<i64: 1, 1, 1>, scalar_prefetch = 0 : i64, scratch_operands = 1 : i64, tpu.core_type = #tpu.core_type<tc>, window_params = [{transform_indices = @transform_0, window_bounds = array<i64: 16, 32>}, {transform_indices = @transform_1, window_bounds = array<i64: 32, 32>}, {transform_indices = @transform_2, window_bounds = array<i64: 16, 32>}]} {
    %c0_i32 = arith.constant 0 : i32
    %0 = arith.cmpi eq, %arg2, %c0_i32 : i32
    %1 = arith.extui %0 : i1 to i32
    %c0_i32_0 = arith.constant 0 : i32
    %2 = arith.cmpi ne, %1, %c0_i32_0 : i32
    scf.if %2 {
      %cst_10 = arith.constant 0.000000e+00 : f32
      %12 = vector.broadcast %cst_10 : f32 to vector<16x32xf32>
      %c0_11 = arith.constant 0 : index
      %c0_12 = arith.constant 0 : index
      %13 = vector.load %arg6[%c0_11, %c0_12] : memref<16x32xf32, #tpu.memory_space<vmem>>, vector<16x32xf32>
      tpu.vector_store %arg6[%c0_11, %c0_12], %12 {strides = array<i32>} : memref<16x32xf32, #tpu.memory_space<vmem>>, vector<16x32xf32>,
    } else {
    }
    %c0 = arith.constant 0 : index
    %c0_1 = arith.constant 0 : index
    %3 = vector.load %arg6[%c0, %c0_1] : memref<16x32xf32, #tpu.memory_space<vmem>>, vector<16x32xf32>
    %c0_2 = arith.constant 0 : index
    %c0_3 = arith.constant 0 : index
    %4 = vector.load %arg3[%c0_2, %c0_3] : memref<16x32xf32, #tpu.memory_space<vmem>>, vector<16x32xf32>
    %c0_4 = arith.constant 0 : index
    %c0_5 = arith.constant 0 : index
    %5 = vector.load %arg4[%c0_4, %c0_5] : memref<32x32xf32, #tpu.memory_space<vmem>>, vector<32x32xf32>
    %cst = arith.constant dense<0.000000e+00> : vector<16x32xf32>
    %6 = tpu.matmul %4, %5, %cst {dimension_numbers = #tpu.dot_dimension_numbers<[1], [1], [0], [0], [0, 0, 1, 0], [], []>} : vector<16x32xf32>, vector<32x32xf32>, vector<16x32xf32> -> vector<16x32xf32>
    %7 = arith.addf %3, %6 : vector<16x32xf32>
    %c0_6 = arith.constant 0 : index
    %c0_7 = arith.constant 0 : index
    %8 = vector.load %arg6[%c0_6, %c0_7] : memref<16x32xf32, #tpu.memory_space<vmem>>, vector<16x32xf32>
    tpu.vector_store %arg6[%c0_6, %c0_7], %7 {strides = array<i32>} : memref<16x32xf32, #tpu.memory_space<vmem>>, vector<16x32xf32>,
    %c0_i32_8 = arith.constant 0 : i32
    %9 = arith.cmpi eq, %arg2, %c0_i32_8 : i32
    %10 = arith.extui %9 : i1 to i32
    %c0_i32_9 = arith.constant 0 : i32
    %11 = arith.cmpi ne, %10, %c0_i32_9 : i32
    scf.if %11 {
      %c0_10 = arith.constant 0 : index
      %c0_11 = arith.constant 0 : index
      %12 = vector.load %arg6[%c0_10, %c0_11] : memref<16x32xf32, #tpu.memory_space<vmem>>, vector<16x32xf32>
      %cst_12 = arith.constant 0.176776692 : f32
      %13 = vector.broadcast %cst_12 : f32 to vector<16x32xf32>
      %14 = arith.mulf %12, %13 : vector<16x32xf32>
      %c0_13 = arith.constant 0 : index
      %c0_14 = arith.constant 0 : index
      %15 = vector.load %arg5[%c0_13, %c0_14] : memref<16x32xf32, #tpu.memory_space<vmem>>, vector<16x32xf32>
      tpu.vector_store %arg5[%c0_13, %c0_14], %14 {strides = array<i32>} : memref<16x32xf32, #tpu.memory_space<vmem>>, vector<16x32xf32>,
    } else {
    }
    return
  }
  func.func @transform_0(%arg0: i32, %arg1: i32, %arg2: i32) -> (i32, i32) {
    %c0_i32 = arith.constant 0 : i32
    return %arg0, %arg2 : i32, i32
  }
  func.func @transform_1(%arg0: i32, %arg1: i32, %arg2: i32) -> (i32, i32) {
    %c0_i32 = arith.constant 0 : i32
    return %arg1, %arg2 : i32, i32
  }
  func.func @transform_2(%arg0: i32, %arg1: i32, %arg2: i32) -> (i32, i32) {
    %c0_i32 = arith.constant 0 : i32
    return %arg0, %arg1 : i32, i32
  }
}

</mosaic_0001>

<bundles_post_ra>
// kernel: tpu_custom_call.1
= control target key start
LH: loop header
LB: loop body
LE: loop exit
PB: predicated region body
PF: predicated region fallthrough
CT: control target
= control target key end

     0   :  { %7 = vsyncpa [#allocation4], 0  ;;  %s330_s0 = inlined_call_operand.hbm [shape: f32[16,32], index: 0, kind: input, shape index: {}]   ;;  %s331_s1 = inlined_call_operand.hbm [shape: f32[32,32], index: 1, kind: input, shape index: {}]   ;;  %s332_s2 = inlined_call_operand.hbm [shape: f32[16,32], index: 2, kind: output, shape index: {}]  }
   0x1   :  { %8 = vsyncpa [#allocation7], 0 }
   0x2   :  { %9 = vsyncpa [#allocation5], 0  ;;  %s275_s9 = smov [#allocation3]  }
   0x3   :  { %s15_s10 = sshll.u32 %s275_s9, 4  ;;  %s16_s10 = int_to_ptr.vmem [resolvable:$true] %s15_s10 }
   0x4   :  { %s217_s11 = scalar_lea.vmem %s16_s10, 256  ;;  %p222_p1 = scmp.lt.s32.totalorder %s16_s10, %s16_s10 }
   0x5   :  { %p218_p0 = scmp.ne.s32.totalorder %s16_s10, %s217_s11  ;;  %p223_p2 = scmp.lt.s32.totalorder %s217_s11, %s217_s11 }
   0x7   :  { %p224_p3 = por %p223_p2, %p222_p1 }
   0x9   :  { %p225_p4 = pnand %p224_p3, %p218_p0 }
   0xb   :  { %228 = shalt.err (!%p225_p4)
}
   0xc   :  { %s276_s12 = smov 128   ;;  %s277_s13 = smov 8  }
   0xd   :  { %21 = dma.hbm_to_vmem [thread:$0]  %s330_s0, 256, %s16_s10, [#allocation4], %s276_s12, %s276_s12, %s277_s13  }
   0xe   :  { %s278_s16 = smov [#allocation6]  }
   0xf   :  { %s27_s17 = sshll.u32 %s278_s16, 4  ;;  %s28_s17 = int_to_ptr.vmem [resolvable:$true] %s27_s17 }
  0x10   :  { %s237_s18 = scalar_lea.vmem %s28_s17, 512  ;;  %p242_p6 = scmp.lt.s32.totalorder %s28_s17, %s28_s17 }
  0x11   :  { %p238_p5 = scmp.ne.s32.totalorder %s28_s17, %s237_s18  ;;  %p243_p7 = scmp.lt.s32.totalorder %s237_s18, %s237_s18 }
  0x13   :  { %p244_p8 = por %p243_p7, %p242_p6 }
  0x15   :  { %p245_p9 = pnand %p244_p8, %p238_p5 }
  0x17   :  { %248 = shalt.err (!%p245_p9)
}
  0x18   :  { %33 = dma.hbm_to_vmem [thread:$0]  %s331_s1, 512, %s28_s17, [#allocation7], %s276_s12, %s276_s12, %s277_s13  }
  0x19   :  { %269 = dma.done.wait [#allocation4], 256  }
  0x1a   :  { %270 = vsyncadd [#allocation4], 4294967040 }
  0x1b   :  { %271 = dma.done.wait [#allocation7], 512  }
  0x1c   :  { %272 = vsyncadd [#allocation7], 4294966784  ;;  %vm44_vm0 = vcmask 261120   ;;  %v279_v0 = vmov 0.0   ;;  %v54_v1 = vld [vmem:[#allocation6 + $0x18] sm:$0xff]  ;;  %v53_v2 = vld [vmem:[#allocation6 + $0x10] sm:$0xff] }
  0x1d   :  { %46 = vst.msk [vmem:[#allocation2 + $0x8] sm:$0xff] %vm44_vm0, %v279_v0  ;;  %45 = vst.msk [vmem:[#allocation2] sm:$0xff] %vm44_vm0, %v279_v0  ;;  %192 = vmatprep.subr.msk.mxu0 %vm44_vm0, %v54_v1  ;;  %v49_v3 = vld [vmem:[#allocation3] sm:$0xff]  ;;  %v52_v4 = vld [vmem:[#allocation6 + $0x8] sm:$0xff]  ;;  %s280_s0 = smov [#allocation8]  }
  0x1e   :  { %193 = vmatpush3.xpose.msk.msra.mxu0 %vm44_vm0, %v54_v1  ;;  %200 = vmatprep.mubr.msk.f32.mxu0 %vm44_vm0, %v49_v3  ;;  %v51_v5 = vld [vmem:[#allocation6] sm:$0xff]  ;;  %v50_v6 = vld [vmem:[#allocation3 + $0x8] sm:$0xff]  ;;  %s167_s1 = sshll.u32 %s280_s0, 4  ;;  %s168_s1 = int_to_ptr.vmem [resolvable:$true] %s167_s1 }
  0x1f   :  { %194 = vmatprep.subr.msk.mxu0 %vm44_vm0, %v53_v2  ;;  %s249_s21 = scalar_lea.vmem %s168_s1, 256  ;;  %p254_p11 = scmp.lt.s32.totalorder %s168_s1, %s168_s1 }
  0x20   :  { %p250_p10 = scmp.ne.s32.totalorder %s168_s1, %s249_s21  ;;  %p255_p12 = scmp.lt.s32.totalorder %s249_s21, %s249_s21 }
  0x22   :  { %195 = vmatpush3.xpose.msk.msra.mxu0 %vm44_vm0, %v53_v2  ;;  %p256_p13 = por %p255_p12, %p254_p11 }
  0x23   :  { %196 = vmatprep.subr.msk.mxu0 %vm44_vm0, %v52_v4 }
  0x24   :  { %v48_v7 = vld [vmem:[#allocation2 + $0x8] sm:$0xff]  ;;  %v47_v9 = vld [vmem:[#allocation2] sm:$0xff]  ;;  %p257_p0 = pnand %p256_p13, %p250_p10 }
  0x26   :  { %197 = vmatpush3.xpose.msk.msra.mxu0 %vm44_vm0, %v52_v4 }
  0x27   :  { %198 = vmatprep.subr.msk.mxu0 %vm44_vm0, %v51_v5 }
  0x2a   :  { %199 = vmatpush3.xpose.msk.msra.mxu0 %vm44_vm0, %v51_v5 }
  0x2d   :  { %201 = vmatmul.mubr.msk.f32.vlgmr.msra.gmra.mxu0 %vm44_vm0, %v50_v6 }
  0xed   :  { %v202_v8 = vpop.f32.mrf.mxu0 }
  0xee   :  { %v150_v10 = vadd.f32 %v202_v8, %v48_v7 }
  0xef   :  { %v140_v11 = vpop.f32.mrf.mxu0 }
  0xf0   :  { %152 = vst.msk [vmem:[#allocation2 + $0x8] sm:$0xff] %vm44_vm0, %v150_v10  ;;  %v149_v12 = vadd.f32 %v140_v11, %v47_v9 }
  0xf2   :  { %151 = vst.msk [vmem:[#allocation2] sm:$0xff] %vm44_vm0, %v149_v12 }
  0xf7   :  { %v157_v13 = vld [vmem:[#allocation2 + $0x8] sm:$0xff] }
  0xf8   :  { %v159_v14 = vmul.f32 0.17677669, %v157_v13 }
  0xf9   :  { %v156_v15 = vld [vmem:[#allocation2] sm:$0xff] }
  0xfa   :  { %v158_v16 = vmul.f32 0.17677669, %v156_v15  ;;  %161 = vst.msk [vmem:[#allocation8 + $0x8] sm:$0xff] %vm44_vm0, %v159_v14 }
  0xfc   :  { %160 = vst.msk [vmem:[#allocation8] sm:$0xff] %vm44_vm0, %v158_v16 }
  0xfd   :  { %260 = shalt.err (!%p257_p0)
}
  0xfe   :  { %173 = dma.vmem_to_hbm [thread:$0]  %s168_s1, 256, %s332_s2, [#allocation5], %s276_s12, %s276_s12, %s277_s13  }
  0xff   :  { %273 = dma.done.wait [#allocation5], 256  }
 0x100   :  { %274 = vsyncadd [#allocation5], 4294967040 }
 0x101   :  { %177 = vsyncpa [#allocation4], 1 }
 0x102   :  { %178 = vsyncpa [#allocation7], 1 }
 0x103   :  { %179 = vsyncpa [#allocation5], 1 }

</bundles_post_ra>
